<compile_context>
chip_gen: v7x
topology: tpu7x:2x2x1
jax: 0.10.0
libtpu: 0.0.40
codegen_flags: <defaults>
</compile_context>

<pallas_src>
import jax
import jax.numpy as jnp
from jax.experimental import pallas as pl
from jax.experimental.pallas import tpu as pltpu


# ----------------------------------------------------------------------------
# Small helpers
# ----------------------------------------------------------------------------

def _round_up(x, m):
  return (x + m - 1) // m * m


def _pick_batch_tile(b):
  """Batch tile: multiple of 16 (bf16 sublane tile); >=2 grid steps when b>16."""
  if b <= 16:
    return 16
  return min(128, _round_up((b + 1) // 2, 16))


def _pad_rows(x, rows):
  if x.shape[0] == rows:
    return x
  pad = jnp.zeros((rows - x.shape[0],) + x.shape[1:], x.dtype)
  return jnp.concatenate([x, pad], axis=0)


def _init(key, shape, scale=0.1):
  return scale * jax.random.normal(key, shape, dtype=jnp.float32)


# ----------------------------------------------------------------------------
# Fused Pallas kernel (factory over the static "has positional embedding" flag)
# ----------------------------------------------------------------------------

def _make_molecule_vae_kernel(use_pos: bool):
  """Whole MoleculeVAE forward for one batch tile; all weights VMEM-resident."""

  def kernel(*refs):
    if use_pos:
      (node_code_ref, pos_code_ref, edge_ref, eps_ref,
       w_enc_edge_ref, w_node_enc_ref, w_pos_enc_ref, b_enc_ref,
       w_ml_ref, b_ml_ref,
       w_dec_z_ref, w_pos_dec_ref, b_dec_ref,
       w_head_ref, b_head_ref,
       head_ref, ml_ref) = refs
    else:
      (node_code_ref, edge_ref, eps_ref,
       w_enc_edge_ref, w_node_enc_ref, b_enc_ref,
       w_ml_ref, b_ml_ref,
       w_dec_z_ref, b_dec_ref,
       w_head_ref, b_head_ref,
       head_ref, ml_ref) = refs
      pos_code_ref = w_pos_enc_ref = w_pos_dec_ref = None

    tb = edge_ref.shape[0]
    nv = node_code_ref.shape[1]
    latent = eps_ref.shape[1]

    # Combined one-hot over all node slots at once: column j is hot iff
    # node_code[i, j] == j (codes were built as slot*V + idx in the wrapper).
    # Single hoisted iota; single K=N*V MXU matmul against the effective weights.
    oh_node = (node_code_ref[...] ==
               jax.lax.broadcasted_iota(jnp.int32, (tb, nv), 1)
               ).astype(jnp.bfloat16)

    # Encoder pre-activation (split-K, no concat): edge path + embedded-node path.
    h = (jnp.dot(edge_ref[...], w_enc_edge_ref[...],
                 preferred_element_type=jnp.float32)
         + jnp.dot(oh_node, w_node_enc_ref[...],
                   preferred_element_type=jnp.float32)
         + b_enc_ref[...])

    if use_pos:
      npx = pos_code_ref.shape[1]
      oh_pos = (pos_code_ref[...] ==
                jax.lax.broadcasted_iota(jnp.int32, (tb, npx), 1)
                ).astype(jnp.bfloat16)
      h = h + jnp.dot(oh_pos, w_pos_enc_ref[...],
                      preferred_element_type=jnp.float32)

    h = jnp.maximum(h, 0.0).astype(jnp.bfloat16)          # relu in f32, cast for MXU

    # mu | logvar as one fused matmul (w_ml zero-padded to 128 cols -> dense store).
    ml = (jnp.dot(h, w_ml_ref[...], preferred_element_type=jnp.float32)
          + b_ml_ref[...])
    mu = ml[:, :latent]
    logvar = ml[:, latent:2 * latent]

    # Reparameterize in f32 (exp runs on the EUP slot).
    z = (mu + jnp.exp(0.5 * logvar) * eps_ref[...]).astype(jnp.bfloat16)

    # Decoder, split-K over (z, positional).
    hd = (jnp.dot(z, w_dec_z_ref[...], preferred_element_type=jnp.float32)
          + b_dec_ref[...])
    if use_pos:
      hd = hd + jnp.dot(oh_pos, w_pos_dec_ref[...],
                        preferred_element_type=jnp.float32)
    hd = jnp.maximum(hd, 0.0).astype(jnp.bfloat16)

    # Fused heads: [edge_logits | node_logits] -> lane-dense 384-wide store.
    head_ref[...] = (jnp.dot(hd, w_head_ref[...],
                             preferred_element_type=jnp.float32)
                     + b_head_ref[...])
    ml_ref[...] = ml

  return kernel


def molecule_vae_fused_forward(node_code, pos_code, edge_flat, eps,
                               w_enc_edge, w_node_enc_eff, w_pos_enc_eff, b_enc,
                               w_ml_pad, b_ml_pad,
                               w_dec_z, w_pos_dec_eff, b_dec,
                               w_head, b_head):
  """Single pallas_call for the whole forward. Returns (head, ml_padded)."""
  use_pos = pos_code is not None
  b = edge_flat.shape[0]
  d_head = w_head.shape[1]
  ml_w = w_ml_pad.shape[1]

  tb = _pick_batch_tile(b)
  b_pad = _round_up(b, tb)
  grid = (b_pad // tb,)

  def row_spec(width):
    return pl.BlockSpec((tb, width), lambda i: (i, 0))

  def weight_spec(arr):
    # Constant index_map -> block stays resident in VMEM across batch tiles.
    # TODO(synk): at much larger E/N, mark these pipeline_mode=pl.Buffered(1)
    # so the (pointless) double-buffering of constant weights is dropped.
    return pl.BlockSpec(arr.shape, lambda i: (0, 0))

  rows = [node_code] + ([pos_code] if use_pos else []) + [edge_flat, eps]
  rows = [_pad_rows(x, b_pad) for x in rows]
  weights = ([w_enc_edge, w_node_enc_eff]
             + ([w_pos_enc_eff] if use_pos else [])
             + [b_enc, w_ml_pad, b_ml_pad, w_dec_z]
             + ([w_pos_dec_eff] if use_pos else [])
             + [b_dec, w_head, b_head])

  head, ml = pl.pallas_call(
      _make_molecule_vae_kernel(use_pos),
      grid=grid,
      in_specs=([row_spec(x.shape[1]) for x in rows]
                + [weight_spec(w) for w in weights]),
      out_specs=(pl.BlockSpec((tb, d_head), lambda i: (i, 0)),
                 pl.BlockSpec((tb, ml_w), lambda i: (i, 0))),
      out_shape=(jax.ShapeDtypeStruct((b_pad, d_head), jnp.float32),
                 jax.ShapeDtypeStruct((b_pad, ml_w), jnp.float32)),
      compiler_params=pltpu.CompilerParams(
          dimension_semantics=("parallel",),
          vmem_limit_bytes=32 * 1024 * 1024),
  )(*rows, *weights)
  return head[:b], ml[:b]


# ----------------------------------------------------------------------------
# Synthetic sub-modules (deterministic parameters, bf16 matmul operands)
# ----------------------------------------------------------------------------

class NodeEmbedding:
  """Embedding table [V, D]; the lookup is folded into the fused kernel."""

  def __init__(self, key, vocab_size, dim):
    self.table = _init(key, (vocab_size, dim)).astype(jnp.bfloat16)


class PositionalEmbedding:
  """Embedding table [Npos, D]; the lookup is folded into the fused kernel."""

  def __init__(self, key, num_positions, dim):
    self.table = _init(key, (num_positions, dim)).astype(jnp.bfloat16)


class SimpleVAEModel:
  """Encoder/decoder MLP VAE over edge + node (+ positional) features."""

  def __init__(self, key, *, num_edge_ch, num_nodes, node_dim, node_vocab,
               hidden, latent):
    self.E, self.N, self.D = num_edge_ch, num_nodes, node_dim
    self.V, self.H, self.L = node_vocab, hidden, latent
    d_edge = num_edge_ch * num_nodes * num_nodes
    d_node = num_nodes * node_dim
    d_head = d_edge + num_nodes * node_vocab      # 256 + 128 = 384 (lane-dense)

    ks = jax.random.split(key, 6)
    bf16 = jnp.bfloat16
    self.w_enc_edge = _init(ks[0], (d_edge, hidden)).astype(bf16)
    self.w_enc_node = _init(ks[1], (d_node, hidden)).astype(bf16)
    self.b_enc = jnp.zeros((1, hidden), jnp.float32)
    self.w_ml = _init(ks[2], (hidden, 2 * latent)).astype(bf16)   # [w_mu | w_logvar]
    self.b_ml = jnp.zeros((1, 2 * latent), jnp.float32)
    self.w_dec_z = _init(ks[3], (latent, hidden)).astype(bf16)
    self.w_dec_pos = _init(ks[4], (d_node, hidden)).astype(bf16)
    self.b_dec = jnp.zeros((1, hidden), jnp.float32)
    self.w_head = _init(ks[5], (hidden, d_head)).astype(bf16)     # [w_edge | w_node]
    self.b_head = jnp.zeros((1, d_head), jnp.float32)

    # Zero-pad mu|logvar weights to a 128-wide (lane-dense) output slab.
    ml_w = _round_up(2 * latent, 128)
    self.w_ml_pad = jnp.zeros((hidden, ml_w), bf16).at[:, :2 * latent].set(self.w_ml)
    self.b_ml_pad = jnp.zeros((1, ml_w), jnp.float32).at[:, :2 * latent].set(self.b_ml)

  def _effective_weights(self, node_table, pos_table):
    """Fold embedding tables into the first-layer weights (done once, in f32)."""
    f32 = jnp.float32
    wn = self.w_enc_node.astype(f32).reshape(self.N, self.D, self.H)
    w_node_enc_eff = jnp.einsum('vd,ndh->nvh', node_table.astype(f32), wn)
    w_node_enc_eff = w_node_enc_eff.reshape(self.N * self.V, self.H).astype(jnp.bfloat16)
    if pos_table is None:
      return w_node_enc_eff, None, None
    pt = pos_table.astype(f32)
    n_pos = pt.shape[0]
    wd = self.w_dec_pos.astype(f32).reshape(self.N, self.D, self.H)
    w_pos_enc_eff = jnp.einsum('pd,ndh->nph', pt, wn)
    w_pos_enc_eff = w_pos_enc_eff.reshape(self.N * n_pos, self.H).astype(jnp.bfloat16)
    w_pos_dec_eff = jnp.einsum('pd,ndh->nph', pt, wd)
    w_pos_dec_eff = w_pos_dec_eff.reshape(self.N * n_pos, self.H).astype(jnp.bfloat16)
    return w_node_enc_eff, w_pos_enc_eff, w_pos_dec_eff

  def __call__(self, edge_features, node_idx, pos_idx, node_table, pos_table,
               generator=None):
    b = edge_features.shape[0]
    edge_flat = edge_features.reshape(b, -1).astype(jnp.bfloat16)

    # TODO(synk): torch.Generator has no Pallas equivalent; eps is drawn with
    # jax.random (different stream than torch) and fed as a tiny f32 input.
    if generator is None:
      generator = jax.random.PRNGKey(42)
    eps = jax.random.normal(generator, (b, self.L), dtype=jnp.float32)

    w_node_enc_eff, w_pos_enc_eff, w_pos_dec_eff = self._effective_weights(
        node_table, pos_table)

    # Expanded index codes: column k*V+v of the in-kernel combined one-hot is hot
    # iff node_idx[:, k] == v  <=>  code == column index (single in-kernel compare).
    slot = jnp.arange(self.N, dtype=jnp.int32)[None, :]
    node_code = jnp.repeat(node_idx + self.V * slot, self.V, axis=1)     # (b, N*V)
    if pos_table is not None:
      n_pos = pos_table.shape[0]
      pos_code = jnp.repeat(pos_idx + n_pos * slot, n_pos, axis=1)       # (b, N*Npos)
    else:
      pos_code = None

    head, ml = molecule_vae_fused_forward(
        node_code, pos_code, edge_flat, eps,
        self.w_enc_edge, w_node_enc_eff, w_pos_enc_eff, self.b_enc,
        self.w_ml_pad, self.b_ml_pad,
        self.w_dec_z, w_pos_dec_eff, self.b_dec,
        self.w_head, self.b_head)

    d_edge = self.E * self.N * self.N
    edge_logits = head[:, :d_edge].reshape(b, self.E, self.N, self.N)
    node_logits = head[:, d_edge:].reshape(b, self.N, self.V)
    mu = ml[:, :self.L]
    logvar = ml[:, self.L:2 * self.L]
    return edge_logits, node_logits, mu, logvar


class MoleculeVAE:
  """Mirror of the PyTorch MoleculeVAE wrapper (forward fused in one kernel)."""

  def __init__(self, vae_model, node_embedding, positional_embedding=None):
    self.vae_model = vae_model
    self.node_embedding = node_embedding
    self.positional_embedding = positional_embedding

  def forward(self, edge_features, node_features, positional_features=None,
              generator=None):
    node_table = self.node_embedding.table
    # NOTE: torch nn.Embedding raises on out-of-range indices; here they are
    # clamped (review: clamp or assert on untrusted indices).
    node_idx = jnp.clip(node_features.astype(jnp.int32), 0,
                        node_table.shape[0] - 1)
    if self.positional_embedding is not None:
      pos_table = self.positional_embedding.table
      pos_idx = jnp.clip(positional_features.astype(jnp.int32), 0,
                         pos_table.shape[0] - 1)
    else:
      pos_table = None
      pos_idx = None
    return self.vae_model(edge_features, node_idx, pos_idx, node_table,
                          pos_table, generator=generator)

  __call__ = forward


# ----------------------------------------------------------------------------
# Pure-JAX reference (embed-then-linear, f32) for correctness checking
# ----------------------------------------------------------------------------

def _reference_forward(model, edge_features, node_features, positional_features,
                       eps):
  vm = model.vae_model
  f32 = jnp.float32
  b = edge_features.shape[0]
  node_idx = node_features.astype(jnp.int32)
  node_emb = model.node_embedding.table.astype(f32)[node_idx]
  if model.positional_embedding is not None:
    pos_idx = positional_features.astype(jnp.int32)
    pos_emb = model.positional_embedding.table.astype(f32)[pos_idx]
  else:
    pos_emb = jnp.zeros_like(node_emb)
  edge_flat = edge_features.reshape(b, -1).astype(f32)
  node_flat = (node_emb + pos_emb).reshape(b, -1)
  pos_flat = pos_emb.reshape(b, -1)
  h = jnp.maximum(edge_flat @ vm.w_enc_edge.astype(f32)
                  + node_flat @ vm.w_enc_node.astype(f32) + vm.b_enc, 0.0)
  ml = h @ vm.w_ml.astype(f32) + vm.b_ml
  mu, logvar = ml[:, :vm.L], ml[:, vm.L:]
  z = mu + jnp.exp(0.5 * logvar) * eps
  hd = jnp.maximum(z @ vm.w_dec_z.astype(f32)
                   + pos_flat @ vm.w_dec_pos.astype(f32) + vm.b_dec, 0.0)
  head = hd @ vm.w_head.astype(f32) + vm.b_head
  d_edge = vm.E * vm.N * vm.N
  edge_logits = head[:, :d_edge].reshape(b, vm.E, vm.N, vm.N)
  node_logits = head[:, d_edge:].reshape(b, vm.N, vm.V)
  return edge_logits, node_logits, mu, logvar


# ----------------------------------------------------------------------------
# Main
# ----------------------------------------------------------------------------

if __name__ == "__main__":
  B, E, N = 32, 4, 8      # batch, edge feature channels, nodes (B=32 -> 2 grid steps)
  V, D = 16, 32           # node vocab, node embedding dim
  H, L = 64, 16           # hidden, latent

  root = jax.random.PRNGKey(0)
  k_node, k_pos, k_vae, k_e, k_n, k_gen = jax.random.split(root, 6)

  node_embedding = NodeEmbedding(k_node, V, D)
  positional_embedding = PositionalEmbedding(k_pos, N, D)
  vae_model = SimpleVAEModel(k_vae, num_edge_ch=E, num_nodes=N, node_dim=D,
                             node_vocab=V, hidden=H, latent=L)
  model = MoleculeVAE(vae_model, node_embedding, positional_embedding)

  edge_features = jax.random.normal(k_e, (B, E, N, N), dtype=jnp.float32)
  node_features = jax.random.randint(k_n, (B, N), 0, V, dtype=jnp.int32)
  positional_features = jnp.broadcast_to(
      jnp.arange(N, dtype=jnp.int32)[None, :], (B, N))

  edge_logits, node_logits, mu, logvar = model(
      edge_features, node_features, positional_features, generator=k_gen)
  jax.block_until_ready((edge_logits, node_logits, mu, logvar))

  assert edge_logits.shape == (B, E, N, N)
  assert node_logits.shape == (B, N, V)
  assert mu.shape == (B, L) and logvar.shape == (B, L)

  # Numerical check against the pure-JAX reference (same eps). Tolerance reflects
  # the bf16 MXU operands (f32 accumulation) used by the kernel.
  eps = jax.random.normal(k_gen, (B, L), dtype=jnp.float32)
  ref = _reference_forward(model, edge_features, node_features,
                           positional_features, eps)
  for got, want in zip((edge_logits, node_logits, mu, logvar), ref):
    assert got.shape == want.shape
    assert jnp.allclose(got, want, rtol=2e-2, atol=2e-2), (
        float(jnp.max(jnp.abs(got - want))))

  # Also exercise the statically-specialized "no positional embedding" kernel.
  model_nopos = MoleculeVAE(vae_model, node_embedding, None)
  out_nopos = model_nopos(edge_features, node_features, None, generator=k_gen)
  jax.block_until_ready(out_nopos)
  ref_nopos = _reference_forward(model_nopos, edge_features, node_features,
                                 None, eps)
  for got, want in zip(out_nopos, ref_nopos):
    assert got.shape == want.shape
    assert jnp.allclose(got, want, rtol=2e-2, atol=2e-2), (
        float(jnp.max(jnp.abs(got - want))))

  print("KERNEL_OK")
</pallas_src>

<mosaic_0001>
module attributes {stable_mosaic.version = 11 : i64} {
  func.func @kernel(%arg0: i32, %arg1: memref<16x128xi32, #tpu.memory_space<vmem>>, %arg2: memref<16x64xi32, #tpu.memory_space<vmem>>, %arg3: memref<16x256xbf16, #tpu.memory_space<vmem>>, %arg4: memref<16x16xf32, #tpu.memory_space<vmem>>, %arg5: memref<256x64xbf16, #tpu.memory_space<vmem>>, %arg6: memref<128x64xbf16, #tpu.memory_space<vmem>>, %arg7: memref<64x64xbf16, #tpu.memory_space<vmem>>, %arg8: memref<1x64xf32, #tpu.memory_space<vmem>>, %arg9: memref<64x128xbf16, #tpu.memory_space<vmem>>, %arg10: memref<1x128xf32, #tpu.memory_space<vmem>>, %arg11: memref<16x64xbf16, #tpu.memory_space<vmem>>, %arg12: memref<64x64xbf16, #tpu.memory_space<vmem>>, %arg13: memref<1x64xf32, #tpu.memory_space<vmem>>, %arg14: memref<64x384xbf16, #tpu.memory_space<vmem>>, %arg15: memref<1x384xf32, #tpu.memory_space<vmem>>, %arg16: memref<16x384xf32, #tpu.memory_space<vmem>>, %arg17: memref<16x128xf32, #tpu.memory_space<vmem>>) attributes {dimension_semantics = [#tpu.dimension_semantics<parallel>], iteration_bounds = array<i64: 2>, scalar_prefetch = 0 : i64, scratch_operands = 0 : i64, tpu.core_type = #tpu.core_type<tc>, window_params = [{transform_indices = @transform_0, window_bounds = array<i64: 16, 128>}, {transform_indices = @transform_1, window_bounds = array<i64: 16, 64>}, {transform_indices = @transform_2, window_bounds = array<i64: 16, 256>}, {transform_indices = @transform_3, window_bounds = array<i64: 16, 16>}, {pipeline_mode = #tpu.pipeline_mode<synchronous>, transform_indices = @transform_4, window_bounds = array<i64: 256, 64>}, {pipeline_mode = #tpu.pipeline_mode<synchronous>, transform_indices = @transform_5, window_bounds = array<i64: 128, 64>}, {pipeline_mode = #tpu.pipeline_mode<synchronous>, transform_indices = @transform_6, window_bounds = array<i64: 64, 64>}, {pipeline_mode = #tpu.pipeline_mode<synchronous>, transform_indices = @transform_7, window_bounds = array<i64: 1, 64>}, {pipeline_mode = #tpu.pipeline_mode<synchronous>, transform_indices = @transform_8, window_bounds = array<i64: 64, 128>}, {pipeline_mode = #tpu.pipeline_mode<synchronous>, transform_indices = @transform_9, window_bounds = array<i64: 1, 128>}, {pipeline_mode = #tpu.pipeline_mode<synchronous>, transform_indices = @transform_10, window_bounds = array<i64: 16, 64>}, {pipeline_mode = #tpu.pipeline_mode<synchronous>, transform_indices = @transform_11, window_bounds = array<i64: 64, 64>}, {pipeline_mode = #tpu.pipeline_mode<synchronous>, transform_indices = @transform_12, window_bounds = array<i64: 1, 64>}, {pipeline_mode = #tpu.pipeline_mode<synchronous>, transform_indices = @transform_13, window_bounds = array<i64: 64, 384>}, {pipeline_mode = #tpu.pipeline_mode<synchronous>, transform_indices = @transform_14, window_bounds = array<i64: 1, 384>}, {transform_indices = @transform_15, window_bounds = array<i64: 16, 384>}, {transform_indices = @transform_16, window_bounds = array<i64: 16, 128>}]} {
    %c0 = arith.constant 0 : index
    %c0_0 = arith.constant 0 : index
    %0 = vector.load %arg1[%c0, %c0_0] : memref<16x128xi32, #tpu.memory_space<vmem>>, vector<16x128xi32>
    %1 = tpu.iota {dimensions = array<i32: 1>} : vector<16x128xi32>
    %2 = arith.cmpi eq, %0, %1 : vector<16x128xi32>
    %3 = arith.extui %2 : vector<16x128xi1> to vector<16x128xi32>
    %4 = arith.sitofp %3 : vector<16x128xi32> to vector<16x128xf32>
    %5 = arith.truncf %4 : vector<16x128xf32> to vector<16x128xbf16>
    %c0_1 = arith.constant 0 : index
    %c0_2 = arith.constant 0 : index
    %6 = vector.load %arg3[%c0_1, %c0_2] : memref<16x256xbf16, #tpu.memory_space<vmem>>, vector<16x256xbf16>
    %c0_3 = arith.constant 0 : index
    %c0_4 = arith.constant 0 : index
    %7 = vector.load %arg5[%c0_3, %c0_4] : memref<256x64xbf16, #tpu.memory_space<vmem>>, vector<256x64xbf16>
    %cst = arith.constant dense<0.000000e+00> : vector<16x64xf32>
    %8 = tpu.matmul %6, %7, %cst {dimension_numbers = #tpu.dot_dimension_numbers<[1], [0], [0], [1], [0, 0, 1, 1], [], []>} : vector<16x256xbf16>, vector<256x64xbf16>, vector<16x64xf32> -> vector<16x64xf32>
    %c0_5 = arith.constant 0 : index
    %c0_6 = arith.constant 0 : index
    %9 = vector.load %arg6[%c0_5, %c0_6] : memref<128x64xbf16, #tpu.memory_space<vmem>>, vector<128x64xbf16>
    %cst_7 = arith.constant dense<0.000000e+00> : vector<16x64xf32>
    %10 = tpu.matmul %5, %9, %cst_7 {dimension_numbers = #tpu.dot_dimension_numbers<[1], [0], [0], [1], [0, 0, 1, 1], [], []>} : vector<16x128xbf16>, vector<128x64xbf16>, vector<16x64xf32> -> vector<16x64xf32>
    %11 = arith.addf %8, %10 : vector<16x64xf32>
    %c0_8 = arith.constant 0 : index
    %c0_9 = arith.constant 0 : index
    %12 = vector.load %arg8[%c0_8, %c0_9] : memref<1x64xf32, #tpu.memory_space<vmem>>, vector<1x64xf32>
    %13 = vector.broadcast %12 : vector<1x64xf32> to vector<16x64xf32>
    %14 = arith.addf %11, %13 : vector<16x64xf32>
    %c0_10 = arith.constant 0 : index
    %c0_11 = arith.constant 0 : index
    %15 = vector.load %arg2[%c0_10, %c0_11] : memref<16x64xi32, #tpu.memory_space<vmem>>, vector<16x64xi32>
    %16 = tpu.iota {dimensions = array<i32: 1>} : vector<16x64xi32>
    %17 = arith.cmpi eq, %15, %16 : vector<16x64xi32>
    %18 = arith.extui %17 : vector<16x64xi1> to vector<16x64xi32>
    %19 = arith.sitofp %18 : vector<16x64xi32> to vector<16x64xf32>
    %20 = arith.truncf %19 : vector<16x64xf32> to vector<16x64xbf16>
    %c0_12 = arith.constant 0 : index
    %c0_13 = arith.constant 0 : index
    %21 = vector.load %arg7[%c0_12, %c0_13] : memref<64x64xbf16, #tpu.memory_space<vmem>>, vector<64x64xbf16>
    %cst_14 = arith.constant dense<0.000000e+00> : vector<16x64xf32>
    %22 = tpu.matmul %20, %21, %cst_14 {dimension_numbers = #tpu.dot_dimension_numbers<[1], [0], [0], [1], [0, 0, 1, 1], [], []>} : vector<16x64xbf16>, vector<64x64xbf16>, vector<16x64xf32> -> vector<16x64xf32>
    %23 = arith.addf %14, %22 : vector<16x64xf32>
    %cst_15 = arith.constant 0.000000e+00 : f32
    %24 = vector.broadcast %cst_15 : f32 to vector<16x64xf32>
    %25 = arith.maximumf %23, %24 : vector<16x64xf32>
    %26 = arith.truncf %25 : vector<16x64xf32> to vector<16x64xbf16>
    %c0_16 = arith.constant 0 : index
    %c0_17 = arith.constant 0 : index
    %27 = vector.load %arg9[%c0_16, %c0_17] : memref<64x128xbf16, #tpu.memory_space<vmem>>, vector<64x128xbf16>
    %cst_18 = arith.constant dense<0.000000e+00> : vector<16x128xf32>
    %28 = tpu.matmul %26, %27, %cst_18 {dimension_numbers = #tpu.dot_dimension_numbers<[1], [0], [0], [1], [0, 0, 1, 1], [], []>} : vector<16x64xbf16>, vector<64x128xbf16>, vector<16x128xf32> -> vector<16x128xf32>
    %c0_19 = arith.constant 0 : index
    %c0_20 = arith.constant 0 : index
    %29 = vector.load %arg10[%c0_19, %c0_20] : memref<1x128xf32, #tpu.memory_space<vmem>>, vector<1x128xf32>
    %30 = vector.broadcast %29 : vector<1x128xf32> to vector<16x128xf32>
    %31 = arith.addf %28, %30 : vector<16x128xf32>
    %32 = vector.extract_strided_slice %31 {offsets = [0, 0], sizes = [16, 16], strides = [1, 1]} : vector<16x128xf32> to vector<16x16xf32>
    %33 = vector.extract_strided_slice %31 {offsets = [0, 16], sizes = [16, 16], strides = [1, 1]} : vector<16x128xf32> to vector<16x16xf32>
    %cst_21 = arith.constant 5.000000e-01 : f32
    %34 = vector.broadcast %cst_21 : f32 to vector<16x16xf32>
    %35 = arith.mulf %34, %33 : vector<16x16xf32>
    %36 = math.exp %35 : vector<16x16xf32>
    %c0_22 = arith.constant 0 : index
    %c0_23 = arith.constant 0 : index
    %37 = vector.load %arg4[%c0_22, %c0_23] : memref<16x16xf32, #tpu.memory_space<vmem>>, vector<16x16xf32>
    %38 = arith.mulf %36, %37 : vector<16x16xf32>
    %39 = arith.addf %32, %38 : vector<16x16xf32>
    %40 = arith.truncf %39 : vector<16x16xf32> to vector<16x16xbf16>
    %c0_24 = arith.constant 0 : index
    %c0_25 = arith.constant 0 : index
    %41 = vector.load %arg11[%c0_24, %c0_25] : memref<16x64xbf16, #tpu.memory_space<vmem>>, vector<16x64xbf16>
    %cst_26 = arith.constant dense<0.000000e+00> : vector<16x64xf32>
    %42 = tpu.matmul %40, %41, %cst_26 {dimension_numbers = #tpu.dot_dimension_numbers<[1], [0], [0], [1], [0, 0, 1, 1], [], []>} : vector<16x16xbf16>, vector<16x64xbf16>, vector<16x64xf32> -> vector<16x64xf32>
    %c0_27 = arith.constant 0 : index
    %c0_28 = arith.constant 0 : index
    %43 = vector.load %arg13[%c0_27, %c0_28] : memref<1x64xf32, #tpu.memory_space<vmem>>, vector<1x64xf32>
    %44 = vector.broadcast %43 : vector<1x64xf32> to vector<16x64xf32>
    %45 = arith.addf %42, %44 : vector<16x64xf32>
    %c0_29 = arith.constant 0 : index
    %c0_30 = arith.constant 0 : index
    %46 = vector.load %arg12[%c0_29, %c0_30] : memref<64x64xbf16, #tpu.memory_space<vmem>>, vector<64x64xbf16>
    %cst_31 = arith.constant dense<0.000000e+00> : vector<16x64xf32>
    %47 = tpu.matmul %20, %46, %cst_31 {dimension_numbers = #tpu.dot_dimension_numbers<[1], [0], [0], [1], [0, 0, 1, 1], [], []>} : vector<16x64xbf16>, vector<64x64xbf16>, vector<16x64xf32> -> vector<16x64xf32>
    %48 = arith.addf %45, %47 : vector<16x64xf32>
    %cst_32 = arith.constant 0.000000e+00 : f32
    %49 = vector.broadcast %cst_32 : f32 to vector<16x64xf32>
    %50 = arith.maximumf %48, %49 : vector<16x64xf32>
    %51 = arith.truncf %50 : vector<16x64xf32> to vector<16x64xbf16>
    %c0_33 = arith.constant 0 : index
    %c0_34 = arith.constant 0 : index
    %52 = vector.load %arg14[%c0_33, %c0_34] : memref<64x384xbf16, #tpu.memory_space<vmem>>, vector<64x384xbf16>
    %cst_35 = arith.constant dense<0.000000e+00> : vector<16x384xf32>
    %53 = tpu.matmul %51, %52, %cst_35 {dimension_numbers = #tpu.dot_dimension_numbers<[1], [0], [0], [1], [0, 0, 1, 1], [], []>} : vector<16x64xbf16>, vector<64x384xbf16>, vector<16x384xf32> -> vector<16x384xf32>
    %c0_36 = arith.constant 0 : index
    %c0_37 = arith.constant 0 : index
    %54 = vector.load %arg15[%c0_36, %c0_37] : memref<1x384xf32, #tpu.memory_space<vmem>>, vector<1x384xf32>
    %55 = vector.broadcast %54 : vector<1x384xf32> to vector<16x384xf32>
    %56 = arith.addf %53, %55 : vector<16x384xf32>
    %c0_38 = arith.constant 0 : index
    %c0_39 = arith.constant 0 : index
    %57 = vector.load %arg16[%c0_38, %c0_39] : memref<16x384xf32, #tpu.memory_space<vmem>>, vector<16x384xf32>
    tpu.vector_store %arg16[%c0_38, %c0_39], %56 {strides = array<i32>} : memref<16x384xf32, #tpu.memory_space<vmem>>, vector<16x384xf32>,
    %c0_40 = arith.constant 0 : index
    %c0_41 = arith.constant 0 : index
    %58 = vector.load %arg17[%c0_40, %c0_41] : memref<16x128xf32, #tpu.memory_space<vmem>>, vector<16x128xf32>
    tpu.vector_store %arg17[%c0_40, %c0_41], %31 {strides = array<i32>} : memref<16x128xf32, #tpu.memory_space<vmem>>, vector<16x128xf32>,
    return
  }
  func.func @transform_0(%arg0: i32) -> (i32, i32) {
    %c0_i32 = arith.constant 0 : i32
    %c0_i32_0 = arith.constant 0 : i32
    return %arg0, %c0_i32 : i32, i32
  }
  func.func @transform_1(%arg0: i32) -> (i32, i32) {
    %c0_i32 = arith.constant 0 : i32
    %c0_i32_0 = arith.constant 0 : i32
    return %arg0, %c0_i32 : i32, i32
  }
  func.func @transform_2(%arg0: i32) -> (i32, i32) {
    %c0_i32 = arith.constant 0 : i32
    %c0_i32_0 = arith.constant 0 : i32
    return %arg0, %c0_i32 : i32, i32
  }
  func.func @transform_3(%arg0: i32) -> (i32, i32) {
    %c0_i32 = arith.constant 0 : i32
    %c0_i32_0 = arith.constant 0 : i32
    return %arg0, %c0_i32 : i32, i32
  }
  func.func @transform_4(%arg0: i32) -> (i32, i32) {
    %c0_i32 = arith.constant 0 : i32
    %c0_i32_0 = arith.constant 0 : i32
    %c0_i32_1 = arith.constant 0 : i32
    return %c0_i32, %c0_i32_0 : i32, i32
  }
  func.func @transform_5(%arg0: i32) -> (i32, i32) {
    %c0_i32 = arith.constant 0 : i32
    %c0_i32_0 = arith.constant 0 : i32
    %c0_i32_1 = arith.constant 0 : i32
    return %c0_i32, %c0_i32_0 : i32, i32
  }
  func.func @transform_6(%arg0: i32) -> (i32, i32) {
    %c0_i32 = arith.constant 0 : i32
    %c0_i32_0 = arith.constant 0 : i32
    %c0_i32_1 = arith.constant 0 : i32
    return %c0_i32, %c0_i32_0 : i32, i32
  }
  func.func @transform_7(%arg0: i32) -> (i32, i32) {
    %c0_i32 = arith.constant 0 : i32
    %c0_i32_0 = arith.constant 0 : i32
    %c0_i32_1 = arith.constant 0 : i32
    return %c0_i32, %c0_i32_0 : i32, i32
  }
  func.func @transform_8(%arg0: i32) -> (i32, i32) {
    %c0_i32 = arith.constant 0 : i32
    %c0_i32_0 = arith.constant 0 : i32
    %c0_i32_1 = arith.constant 0 : i32
    return %c0_i32, %c0_i32_0 : i32, i32
  }
  func.func @transform_9(%arg0: i32) -> (i32, i32) {
    %c0_i32 = arith.constant 0 : i32
    %c0_i32_0 = arith.constant 0 : i32
    %c0_i32_1 = arith.constant 0 : i32
    return %c0_i32, %c0_i32_0 : i32, i32
  }
  func.func @transform_10(%arg0: i32) -> (i32, i32) {
    %c0_i32 = arith.constant 0 : i32
    %c0_i32_0 = arith.constant 0 : i32
    %c0_i32_1 = arith.constant 0 : i32
    return %c0_i32, %c0_i32_0 : i32, i32
  }
  func.func @transform_11(%arg0: i32) -> (i32, i32) {
    %c0_i32 = arith.constant 0 : i32
    %c0_i32_0 = arith.constant 0 : i32
    %c0_i32_1 = arith.constant 0 : i32
    return %c0_i32, %c0_i32_0 : i32, i32
  }
  func.func @transform_12(%arg0: i32) -> (i32, i32) {
    %c0_i32 = arith.constant 0 : i32
    %c0_i32_0 = arith.constant 0 : i32
    %c0_i32_1 = arith.constant 0 : i32
    return %c0_i32, %c0_i32_0 : i32, i32
  }
  func.func @transform_13(%arg0: i32) -> (i32, i32) {
    %c0_i32 = arith.constant 0 : i32
    %c0_i32_0 = arith.constant 0 : i32
    %c0_i32_1 = arith.constant 0 : i32
    return %c0_i32, %c0_i32_0 : i32, i32
  }
  func.func @transform_14(%arg0: i32) -> (i32, i32) {
    %c0_i32 = arith.constant 0 : i32
    %c0_i32_0 = arith.constant 0 : i32
    %c0_i32_1 = arith.constant 0 : i32
    return %c0_i32, %c0_i32_0 : i32, i32
  }
  func.func @transform_15(%arg0: i32) -> (i32, i32) {
    %c0_i32 = arith.constant 0 : i32
    %c0_i32_0 = arith.constant 0 : i32
    return %arg0, %c0_i32 : i32, i32
  }
  func.func @transform_16(%arg0: i32) -> (i32, i32) {
    %c0_i32 = arith.constant 0 : i32
    %c0_i32_0 = arith.constant 0 : i32
    return %arg0, %c0_i32 : i32, i32
  }
}

</mosaic_0001>

<bundles_post_ra>
// kernel: tpu_custom_call.1
= control target key start
LH: loop header
LB: loop body
LE: loop exit
PB: predicated region body
PF: predicated region fallthrough
CT: control target
= control target key end

     0   :  { %s2617_s0 = inlined_call_operand.vmem [shape: s32[32,128], index: 0, kind: input, shape index: {}]   ;;  %s2618_s1 = inlined_call_operand.vmem [shape: s32[32,64], index: 1, kind: input, shape index: {}]   ;;  %s2619_s2 = inlined_call_operand.vmem [shape: bf16[32,256], index: 2, kind: input, shape index: {}]   ;;  %s2620_s3 = inlined_call_operand.vmem [shape: f32[32,16], index: 3, kind: input, shape index: {}]   ;;  %s2621_s4 = inlined_call_operand.vmem [shape: bf16[256,64], index: 4, kind: input, shape index: {}]   ;;  %s2622_s5 = inlined_call_operand.vmem [shape: bf16[128,64], index: 5, kind: input, shape index: {}]   ;;  %s2623_s6 = inlined_call_operand.vmem [shape: bf16[64,64], index: 6, kind: input, shape index: {}]   ;;  %s2624_s7 = inlined_call_operand.vmem [shape: f32[1,64], index: 7, kind: input, shape index: {}]   ;;  %s2625_s8 = inlined_call_operand.vmem [shape: bf16[64,128], index: 8, kind: input, shape index: {}]   ;;  %s2626_s9 = inlined_call_operand.vmem [shape: f32[1,128], index: 9, kind: input, shape index: {}]   ;;  %s2627_s10 = inlined_call_operand.vmem [shape: bf16[16,64], index: 10, kind: input, shape index: {}]   ;;  %s2628_s11 = inlined_call_operand.hbm [shape: bf16[64,64], index: 11, kind: input, shape index: {}]   ;;  %s2629_s12 = inlined_call_operand.vmem [shape: f32[1,64], index: 12, kind: input, shape index: {}]   ;;  %s2630_s13 = inlined_call_operand.vmem [shape: bf16[64,384], index: 13, kind: input, shape index: {}]   ;;  %s2631_s14 = inlined_call_operand.vmem [shape: f32[1,384], index: 14, kind: input, shape index: {}]   ;;  %s2632_s15 = inlined_call_operand.hbm [shape: f32[32,384], index: 15, kind: output, shape index: {0}]   ;;  %s2633_s16 = inlined_call_operand.hbm [shape: f32[32,128], index: 16, kind: output, shape index: {1}]  }
   0x1   :  { %2642 = sst [smem:[#allocation16_spill]] %s2617_s0 }
   0x2   :  { %22 = vsyncpa [#allocation3], 0 }
   0x3   :  { %23 = vsyncpa [#allocation4], 0 }
   0x4   :  { %25 = vsyncpa [#allocation4 + $0x1], 0 }
   0x5   :  { %26 = vsyncpa [#allocation7], 0 }
   0x6   :  { %28 = vsyncpa [#allocation7 + $0x1], 0  ;;  %s2227_s21 = smov 0   ;;  %s2229_s22 = smov 0  }
   0x7   :  { %s2231_s23 = smov 0   ;;  %s2233_s24 = smov 0  }
   0x8 LB: > { %2643 = sst [smem:[#allocation11_spill]] %s2113_s21  ;;  %s2248_s25 = sadd.s32 4294967295, %s2125_s24   ;;  %s2125_s24 = sphi %s2233_s24, %s2661_s24   ;;  %s2121_s23 = sphi %s2231_s23, %s2663_s23   ;;  %s2117_s22 = sphi %s2229_s22, %s2665_s22   ;;  %s2113_s21 = sphi %s2227_s21, %s2664_s21  }
   0x9   : > { %2644 = sst [smem:[#allocation12_spill]] %s2121_s23  ;;  %s1637_s26 = sadd.s32 4294967294, %s2125_s24  }
   0xa   : > { %s2252_s27 = sadd.s32 1, %s2125_s24   ;;  %s376_s28 = sadd.s32 1, %s2121_s23 }
   0xb   : > { %2645 = sst [smem:[#allocation13_spill]] %s2252_s27  ;;  %s373_s29 = ssub.s32 %s2125_s24, %s2252_s27 }
   0xc   : > { %p386_p0 = scmp.ne.s32.totalorder %s2121_s23, %s2117_s22  ;;  %p374_p1 = scmp.eq.s32.totalorder %s373_s29, 0 }
   0xd   : > { %p387_p2 = scmp.eq.s32.totalorder %s2248_s25, 1  ;;  %p392_p3 = scmp.ne.s32.totalorder %s2117_s22, %s2113_s21 }
   0xe   : > { %p393_p4 = scmp.eq.s32.totalorder %s1637_s26, 1  ;;  %p1638_p7 = scmp.ge.s32.totalorder %s2125_s24, 1 }
   0xf   : > { %s2263_s30 = scalar_select %p374_p1, %s2121_s23, %s376_s28  }
  0x10   : > { %p2265_p5 = por %p387_p2, %p386_p0  ;;  %p2269_p6 = por %p393_p4, %p392_p3 }
  0x11   : > { %2646 = sst [smem:[#allocation14_spill]] %s2263_s30  ;;  %p426_p8 = scmp.lt.s32.totalorder %s2125_s24, 3 }
  0x12   : > { %s2647_s0 = scalar_select %p2265_p5, 1, 0 }
  0x13   : > { %s2648_s17 = scalar_select %p2269_p6, 1, 0 }
  0x14   : > { %p2639_p9 = scmp.eq.s32.totalorder %s2248_s25, 0  ;;  %p2276_p10 = pnand %p1638_p7, %p426_p8 }
  0x15   : > { %2649 = sst [smem:[#allocation15_spill]] %s2648_s17  ;;  %s2127_s19 = smov [#allocation2]  }
  0x16   : > { %s2650_s18 = scalar_select %p2276_p10, 1, 0 }
  0x17   : > { %s459_s20 = sshll.u32 %s2127_s19, 4  ;;  %p1880_p11 = pneg %p2276_p10  ;;  %s460_s20 = int_to_ptr.vmem [resolvable:$true] %s459_s20 }
  0x18   : > { %s1999_s30 = scalar_lea.hbm %s2628_s11, 512 }
  0x19   : > { %p2284_p12 = pnand %p2639_p9, %p1880_p11  ;;  %p2000_p13 = scmp.ne.s32.totalorder %s2628_s11, %s1999_s30 }
  0x1a   : > { %p2006_p3 = scmp.lt.u32.totalorder %s1999_s30, %s2628_s11 }
  0x1b   : > { %p2001_p0 = pneg %p2284_p12 }
  0x1d   : > { %p2002_p1 = pnand %p2001_p0, %p2000_p13 }
  0x1f   : > { %p2003_p2 = pneg %p2002_p1 }
  0x21   : > { %p2008_p4 = pnand %p2006_p3, %p2003_p2 }
  0x23   : > { %2011 = shalt.err (!%p2008_p4)
}
  0x24   : > { %s2012_s21 = scalar_lea.vmem %s460_s20, 512  ;;  %p2020_p9 = scmp.lt.s32.totalorder %s460_s20, %s460_s20 }
  0x25   : > { %p2013_p7 = scmp.ne.s32.totalorder %s460_s20, %s2012_s21  ;;  %p2021_p6 = scmp.lt.s32.totalorder %s2012_s21, %s2012_s21 }
  0x27   : > { %p2015_p8 = pnand %p2013_p7, %p2001_p0  ;;  %p2022_p5 = por %p2021_p6, %p2020_p9 }
  0x29   : > { %p2016_p11 = pneg %p2015_p8 }
  0x2b   : > { %p2023_p10 = pnand %p2022_p5, %p2016_p11 }
  0x2d   : > { %2026 = shalt.err (!%p2023_p10)
}
  0x2e   : > { %s2128_s23 = smov 64   ;;  %s2129_s27 = smov 4  }
  0x2f   : > { %1883 = dma.hbm_to_vmem [thread:$0]  (!%p2284_p12), %s2628_s11, 512, %s460_s20, [#allocation3], %s2128_s23, %s2128_s23, %s2129_s27  }
  0x30   : > { %p2652_p13 = scmp.ne.s32.totalorder %s2650_s18, 0 }
  0x31   : > { %p2653_p1 = scmp.eq.s32.totalorder (!%p2652_p13), %s2248_s25, 0 }
  0x32   : > { %521 = sbr.rel (%p2652_p13) target bundleno = 1164 (0x48c), region = 80 }
  0x39   : > { %2100 = dma.done.wait (%p2653_p1), [#allocation3], 512   ;;  %p2654_p0 = pmov %p2653_p1 }
  0x3a   : > { %v2130_v0 = vmov 0.0   ;;  %vm2131_vm0 = vmmov 0   ;;  %v1939_v1 = vld [vmem:[%s2622_s5] sm:$0xff]   ;;  %v1940_v2 = vld [vmem:[%s2622_s5 + $0x8] sm:$0xff]   ;;  %v1942_v6 = vld [vmem:[%s2622_s5 + $0x10] sm:$0xff]   ;;  %s1644_s30 = sshll.u32 %s2248_s25, 1  ;;  %v622_v18 = vlaneseq }
  0x3b   : > { %2102 = vsyncadd (%p2654_p0), [#allocation3], 4294966784  ;;  %1782 = vmatprep.subr.bf16.mxu0 %v2130_v0  ;;  %1798 = vmatprep.mubr.msk.bf16.mxu0 %vm2131_vm0, %v2130_v0  ;;  %v1941_v3 = vld [vmem:[%s2621_s4 + $0x40] sm:$0xff]   ;;  %v1944_v5 = vld [vmem:[%s2621_s4 + $0x48] sm:$0xff]   ;;  %p593_p5 = scmp.lt.s32.totalorder %s1644_s30, 3  ;;  %vm967_vm6 = vcmask 523264  }
  0x3c   : > { %1783 = vmatpush3.bf16.msra.mxu0 %v1939_v1  ;;  %1738 = vmatprep.subr.bf16.mxu1 %v1941_v3  ;;  %v1943_v4 = vld [vmem:[%s2621_s4] sm:$0xff]   ;;  %v1946_v7 = vld [vmem:[%s2621_s4 + $0x8] sm:$0xff]   ;;  %v1947_v8 = vld [vmem:[%s2621_s4 + $0x50] sm:$0xff]   ;;  %v623_v23 = vand.u32 127, %v622_v18  ;;  %v2132_v33 = vmov 1.0|1.0  }
  0x3d   : > { %1784 = vmatprep.subr.bf16.mxu0 %v2130_v0  ;;  %1739 = vmatpush3.bf16.msra.mxu1 %v1943_v4  ;;  %v1945_v9 = vld [vmem:[%s2622_s5 + $0x18] sm:$0xff]   ;;  %v1949_v10 = vld [vmem:[%s2621_s4 + $0x10] sm:$0xff]   ;;  %v1948_v12 = vld [vmem:[%s2622_s5 + $0x20] sm:$0xff]   ;;  %s2667_s30 = smov (!%p593_p5, %s1644_s30), 3  ;;  %s2133_s27 = smov 16   ;;  %vm1144_vm7 = vcmask 130048  }
  0x3e   : > { %1740 = vmatprep.subr.bf16.mxu1 %v1944_v5  ;;  %v1950_v11 = vld [vmem:[%s2621_s4 + $0x58] sm:$0xff]   ;;  %v1953_v14 = vld [vmem:[%s2621_s4 + $0x60] sm:$0xff]   ;;  %v1951_v15 = vld [vmem:[%s2622_s5 + $0x28] sm:$0xff]   ;;  %s2363_s29 = sshll.u32 %s2667_s30, 3  ;;  %s2655_s30 = sld [smem:[#allocation16_spill]] }
  0x3f   : > { %v1952_v13 = vld [vmem:[%s2621_s4 + $0x18] sm:$0xff]   ;;  %v1955_v16 = vld [vmem:[%s2621_s4 + $0x20] sm:$0xff]   ;;  %v1956_v17 = vld [vmem:[%s2621_s4 + $0x68] sm:$0xff]   ;;  %s609_s28 = scalar_lea.vmem %s2619_s2, %s2363_s29  ;;  %s602_s17 = scalar_lea.vmem %s2618_s1, %s2363_s29 }
  0x40   : > { %1785 = vmatpush3.bf16.msra.mxu0 %v1940_v2  ;;  %v1954_v19 = vld [vmem:[%s2622_s5 + $0x30] sm:$0xff]   ;;  %v1958_v20 = vld [vmem:[%s2621_s4 + $0x28] sm:$0xff]   ;;  %v1957_v25 = vld [vmem:[%s2622_s5 + $0x38] sm:$0xff]   ;;  %p2656_p9 = scmp.ne.s32.totalorder %s2647_s0, 0 }
  0x41   : > { %1786 = vmatprep.subr.bf16.mxu0 %v2130_v0  ;;  %1741 = vmatpush3.bf16.msra.mxu1 %v1946_v7  ;;  %v1959_v21 = vld [vmem:[%s2621_s4 + $0x70] sm:$0xff]   ;;  %v1962_v27 = vld [vmem:[%s2621_s4 + $0x78] sm:$0xff]   ;;  %v1967_v28 = vld [vmem:[%s609_s28 + $0x4] ss:$8 sps:$4 sm:$0xff]  }
  0x42   : > { %1742 = vmatprep.subr.bf16.mxu1 %v1947_v8  ;;  %v1960_v26 = vld [vmem:[%s2621_s4 + $0x30] sm:$0xff]   ;;  %v1961_v29 = vld [vmem:[%s2623_s6] sm:$0xff]   ;;  %v1963_v30 = vld [vmem:[%s2621_s4 + $0x38] sm:$0xff]   ;;  %908 = vmatprep.mubr.bf16.mxu1 %v1967_v28 }
  0x43   : > { %v1964_v31 = vld [vmem:[%s2623_s6 + $0x8] sm:$0xff]   ;;  %v926_v34 = vld [vmem:[%s602_s17] sm:$0xff]  ;;  %v1968_v36 = vld [vmem:[%s2623_s6 + $0x10] sm:$0xff]  }
  0x44   : > { %1787 = vmatpush3.bf16.msra.mxu0 %v1942_v6  ;;  %s596_s23 = scalar_lea.vmem %s2655_s30, %s2363_s29  ;;  %v1965_v32 = vld [vmem:[%s609_s28] ss:$8 sps:$4 sm:$0xff]   ;;  %vm928_vm4 = vcmp.eq.s32.totalorder %v926_v34, %v623_v23  ;;  %v1969_v37 = vld [vmem:[%s2623_s6 + $0x18] sm:$0xff]   ;;  %v1972_v43 = vld [vmem:[%s2625_s8 + $0x10] sm:$0xff]   ;;  %s615_s30 = scalar_lea.vmem %s2620_s3, %s2363_s29 }
  0x45   : > { %1788 = vmatprep.subr.bf16.mxu0 %v2130_v0  ;;  %1743 = vmatpush3.bf16.msra.mxu1 %v1949_v10  ;;  %v620_v22 = vld [vmem:[%s596_s23] sm:$0xff]  ;;  %v621_v24 = vld [vmem:[%s596_s23 + $0x8] sm:$0xff]  ;;  %v1684_v38 = vsel %vm928_vm4, 1.0, %v2130_v0  ;;  %v1973_v44 = vld [vmem:[%s2625_s8 + $0x18] sm:$0xff]   ;;  %s2462_s29 = sand.u32 1, %s2117_s22   ;;  %s2136_s28 = smov [#allocation6]  }
  0x46   : > { %1744 = vmatprep.subr.bf16.mxu1 %v1950_v11  ;;  %vm624_vm1 = vcmp.eq.s32.totalorder %v620_v22, %v623_v23  ;;  %vm625_vm2 = vcmp.eq.s32.totalorder %v621_v24, %v623_v23  ;;  %v927_v35 = vld [vmem:[%s602_s17 + $0x8] sm:$0xff]  ;;  %v1970_v41 = vld [vmem:[%s2625_s8] sm:$0xff]   ;;  %s1643_s23 = sshll.u32 %s2462_s29, 4  ;;  %s2031_s19 = sshll.u32 %s2136_s28, 4  ;;  %s2032_s19 = int_to_ptr.vmem [resolvable:$false] %s2031_s19 }
  0x47   : > { %vm1663_vm3 = vmpackc.low %vm625_vm2, %vm624_vm1  ;;  %vm929_vm5 = vcmp.eq.s32.totalorder %v927_v35, %v623_v23  ;;  %v1971_v42 = vld [vmem:[%s2625_s8 + $0x8] sm:$0xff]   ;;  %v1106_v45 = vld [vmem:[%s615_s30] sm:$0xff]  ;;  %s2468_s26 = scalar_lea.vmem [#allocation6], %s1643_s23 }
  0x48   : > { %1789 = vmatpush3.bf16.msra.mxu0 %v1945_v9  ;;  %v1685_v39 = vsel %vm929_vm5, 1.0, %v2130_v0  ;;  %1110 = vrot.lane.b32.xlu0 %v1106_v45, %s2133_s27  ;;  %v1107_v46 = vld [vmem:[%s615_s30 + $0x8] sm:$0xff]  ;;  %v1683_v53 = vld [vmem:[%s2624_s7] ss:$0 sm:$0xff]  ;;  %s2134_s30 = smov 112  }
  0x49   : > { %1790 = vmatprep.subr.bf16.mxu0 %v2130_v0  ;;  %1745 = vmatpush3.bf16.msra.mxu1 %v1952_v13  ;;  %v2431_v40 = vpack.c.bf16 %v1685_v39, %v1684_v38  ;;  %v1691_v2 = vld [vmem:[%s2626_s9] ss:$0 sm:$0xff]  ;;  %v1981_v22 = vld [vmem:[%s2630_s13 + $0x4] ss:$12 sps:$4 sm:$0xff]   ;;  %v1984_v23 = vld [vmem:[%s2630_s13 + $0x1c] ss:$12 sps:$4 sm:$0xff]  }
  0x4a   : > { %1746 = vmatprep.subr.bf16.mxu1 %v1953_v14  ;;  %v1974_v13 = vld [vmem:[%s2627_s10] sm:$0xff]   ;;  %v1985_v35 = vld [vmem:[%s2630_s13 + $0x30] ss:$12 sps:$4 sm:$0xff]   ;;  %v2135_v38 = vmov 0  }
  0x4b   : > { %v1982_v24 = vld [vmem:[%s2630_s13 + $0x18] ss:$12 sps:$4 sm:$0xff]   ;;  %v1987_v34 = vld [vmem:[%s2630_s13 + $0x34] ss:$12 sps:$4 sm:$0xff]  }
  0x4c   : > { %1791 = vmatpush3.bf16.msra.mxu0 %v1948_v12  ;;  %1112 = vrot.lane.b32.xlu0 %v1107_v46, %s2133_s27  ;;  %v1697_v39 = vld [vmem:[%s2629_s12] ss:$0 sm:$0xff]  ;;  %s1728_s27 = sshll.u32 %s2248_s25, 8 }
  0x4d   : > { %1792 = vmatprep.subr.bf16.mxu0 %v2130_v0  ;;  %1747 = vmatpush3.bf16.msra.mxu1 %v1955_v16  ;;  %s2537_s23 = scalar_lea.hbm %s2633_s16, %s1728_s27 }
  0x4e   : > { %1748 = vmatprep.subr.bf16.mxu1 %v1956_v17 }
  0x50   : > { %1793 = vmatpush3.bf16.msra.mxu0 %v1951_v15 }
  0x51   : > { %1794 = vmatprep.subr.bf16.mxu0 %v2130_v0  ;;  %1749 = vmatpush3.bf16.msra.mxu1 %v1958_v20 }
  0x52   : > { %1750 = vmatprep.subr.bf16.mxu1 %v1959_v21  ;;  %v1979_v21 = vld [vmem:[%s2630_s13] ss:$12 sps:$4 sm:$0xff]  }
  0x54   : > { %1795 = vmatpush3.bf16.msra.mxu0 %v1954_v19 }
  0x55   : > { %1796 = vmatprep.subr.bf16.mxu0 %v2130_v0  ;;  %1751 = vmatpush3.bf16.msra.mxu1 %v1960_v26 }
  0x56   : > { %1752 = vmatprep.subr.bf16.mxu1 %v1962_v27 }
  0x58   : > { %1797 = vmatpush3.bf16.msra.mxu0 %v1957_v25 }
  0x59   : > { %1802 = vmatprep.subr.bf16.mxu0 %v2130_v0  ;;  %1753 = vmatpush3.bf16.msra.mxu1 %v1963_v30 }
  0x5a   : > { %1814 = vmatprep.subr.bf16.mxu1 %v2130_v0 }
  0x5b   : > { %1799 = vmatmul.mubr.msk.bf16.vlgmr.msra.gmra.mrb[0].mxu0 %vm1663_vm3, %v2132_v33  ;;  %v1978_v33 = vld [vmem:[#allocation2 + $0x18] sm:$0xff]  }
  0x5c   : > { %1803 = vmatpush3.bf16.msra.mxu0 %v1961_v29  ;;  %1810 = vmatprep.mubr.msk.bf16.mxu0 %vm2131_vm0, %v2130_v0  ;;  %v1975_v29 = vld [vmem:[#allocation2] sm:$0xff]  }
  0x5d   : > { %1804 = vmatprep.subr.bf16.mxu0 %v2130_v0  ;;  %909 = vmatmul.mubr.bf16.vlgmr.msra.gmra.mrb[0].mxu1 %v1965_v32  ;;  %v1977_v32 = vld [vmem:[#allocation2 + $0x10] sm:$0xff]  }
  0x5e   : > { %1822 = vmatprep.mubr.msk.bf16.mxu1 %vm2131_vm0, %v2130_v0  ;;  %1815 = vmatpush3.bf16.msra.mxu1 %v1970_v41 }
  0x5f   : > { %1816 = vmatprep.subr.bf16.mxu1 %v2130_v0 }
  0x60   : > { %1805 = vmatpush3.bf16.msra.mxu0 %v1964_v31  ;;  %v1976_v31 = vld [vmem:[#allocation2 + $0x8] sm:$0xff]  }
  0x61   : > { %1806 = vmatprep.subr.bf16.mxu0 %v2130_v0 }
  0x62   : > { %1817 = vmatpush3.bf16.msra.mxu1 %v1971_v42 }
  0x63   : > { %1818 = vmatprep.subr.bf16.mxu1 %v2130_v0 }
  0x64   : > { %1807 = vmatpush3.bf16.msra.mxu0 %v1968_v36  ;;  %v1990_v36 = vld [vmem:[%s2630_s13 + $0x4c] ss:$12 sps:$4 sm:$0xff]  }
  0x65   : > { %1808 = vmatprep.subr.bf16.mxu0 %v2130_v0 }
  0x66   : > { %1819 = vmatpush3.bf16.msra.mxu1 %v1972_v43 }
  0x67   : > { %1820 = vmatprep.subr.bf16.mxu1 %v2130_v0 }
  0x68   : > { %1809 = vmatpush3.bf16.msra.mxu0 %v1969_v37  ;;  %v1988_v37 = vld [vmem:[%s2630_s13 + $0x48] ss:$12 sps:$4 sm:$0xff]  }
  0x69   : > { %1826 = vmatprep.subr.bf16.mxu0 %v2130_v0 }
  0x6a   : > { %1821 = vmatpush3.bf16.msra.mxu1 %v1973_v44 }
  0x6b   : > { %1811 = vmatmul.mubr.msk.bf16.vlgmr.msra.gmra.mrb[0].mxu0 %vm967_vm6, %v2431_v40  ;;  %1367 = vmatprep.subr.bf16.mxu1 %v1981_v22 }
  0x6c   : > { %1828 = vmatprep.mubr.msk.bf16.mxu0 %vm2131_vm0, %v2130_v0  ;;  %1827 = vmatpush3.bf16.msra.mxu0 %v1974_v13 }
  0x6d   : > { %1832 = vmatprep.subr.bf16.mxu0 %v2130_v0 }
  0xba   : > { %v1111_v14 = vpop.permute.xlu0 %1110 }
  0xbe   : > { %v1113_v19 = vpop.permute.xlu0 %1112 }
 0x130   : > { %v1754_v47 = vpop.f32.mrb[0].mxu1 }
 0x131   : > { %v1755_v48 = vpop.f32.mrb[1].mxu1 }
 0x132   : > { %v1756_v49 = vadd.f32 %v1755_v48, %v1754_v47  ;;  %v1757_v50 = vpop.f32.mrb[2].mxu1  ;;  %v1991_v48 = vld [vmem:[%s2630_s13 + $0x8] ss:$12 sps:$4 sm:$0xff]  }
 0x133   : > { %v1758_v51 = vpop.f32.mrb[3].mxu1 }
 0x134   : > { %v1759_v52 = vadd.f32 %v1758_v51, %v1757_v50  ;;  %v1856_v54 = vadd.f32 %v1756_v49, %v1683_v53  ;;  %v1992_v50 = vld [vmem:[%s2630_s13 + $0x20] ss:$12 sps:$4 sm:$0xff]   ;;  %v1993_v51 = vld [vmem:[%s2630_s13 + $0x38] ss:$12 sps:$4 sm:$0xff]  }
 0x136   : > { %v1858_v58 = vadd.f32 %v1759_v52, %v1683_v53  ;;  %v1994_v52 = vld [vmem:[%s2630_s13 + $0x50] ss:$12 sps:$4 sm:$0xff]  }
 0x13e   : > { %v1005_v55 = vpop.f32.mrb[0].mxu0 }
 0x13f   : > { %v1857_v56 = vadd.f32 %v1856_v54, %v1005_v55  ;;  %v1812_v57 = vpop.f32.mrb[1].mxu0 }
 0x140   : > { %v1008_v59 = vpop.f32.mrb[2].mxu0 }
 0x141   : > { %v1859_v60 = vadd.f32 %v1858_v58, %v1008_v59  ;;  %v1813_v61 = vpop.f32.mrb[3].mxu0  ;;  %v1014_v62 = vmax.f32 %v1857_v56, 0.0 }
 0x143   : > { %v1015_v63 = vmax.f32 %v1859_v60, 0.0 }
 0x145   : > { %v1016_v1 = vpack.c.bf16 %v1015_v63, %v1014_v62 }
 0x147   : > { %1823 = vmatmul.mubr.msk.bf16.vlgmr.msra.gmra.mrb[4].mxu1 %vm967_vm6, %v1016_v1 }
 0x148   : > { %1368 = vmatpush1.bf16.msra.mxu1 %v1979_v21  ;;  %1399 = vmatprep.mubr.bf16.mxu1 %v2135_v38 }
 0x149   : > { %1369 = vmatprep.subr.bf16.mxu1 %v1984_v23 }
 0x14c   : > { %1370 = vmatpush1.bf16.msra.mxu1 %v1982_v24 }
 0x14d   : > { %1371 = vmatprep.subr.bf16.mxu1 %v1987_v34 }
 0x150   : > { %1372 = vmatpush1.bf16.msra.mxu1 %v1985_v35 }
 0x151   : > { %1373 = vmatprep.subr.bf16.mxu1 %v1990_v36 }
 0x154   : > { %1374 = vmatpush1.bf16.msra.mxu1 %v1988_v37 }
 0x155   : > { %1844 = vmatprep.subr.bf16.mxu1 %v2130_v0 }
 0x21a   : > { %v1093_v3 = vpop.f32.mrb[4].mxu1 }
 0x21b   : > { %v1094_v4 = vadd.f32 %v1691_v2, %v1093_v3  ;;  %v1824_v5 = vpop.f32.mrb[5].mxu1 }
 0x21c   : > { %v1096_v6 = vpop.f32.mrb[6].mxu1 }
 0x21d   : > { %v1100_v7 = vmul.f32 0.5, %v1094_v4  ;;  %1457 = vst [vmem:[%s2468_s26] sm:$0xff] %v1094_v4  ;;  %v1097_v8 = vadd.f32 %v1691_v2, %v1096_v6  ;;  %v1825_v9 = vpop.f32.mrb[7].mxu1 }
 0x21f   : > { %v1102_v10 = vmul.f32 1.442695, %v1100_v7  ;;  %v1101_v11 = vmul.f32 0.5, %v1097_v8  ;;  %1458 = vst [vmem:[%s2468_s26 + $0x8] sm:$0xff] %v1097_v8 }
 0x221   : > { %1995 = vpow2.f32 %v1102_v10  ;;  %v1104_v12 = vmul.f32 1.442695, %v1101_v11 }
 0x223   : > { %1997 = vpow2.f32 %v1104_v12 }
 0x22b   : > { %v1996_v15 = vpop.eup %1995 }
 0x22c   : > { %v1116_v16 = vmul.f32 %v1996_v15, %v1111_v14 }
 0x22d   : > { %v1998_v17 = vpop.eup %1997 }
 0x22e   : > { %1120 = vrot.lane.b32.xlu1 %v1116_v16, %s2134_s30  ;;  %v1117_v20 = vmul.f32 %v1998_v17, %v1113_v19 }
 0x232   : > { %1122 = vrot.lane.b32.xlu1 %v1117_v20, %s2134_s30  ;;  %s1495_s30 = sshll.u32 %s2468_s26, 4  ;;  %s2033_s26 = scalar_lea.vmem %s2032_s19, 512  ;;  %s2532_s30 = int_to_ptr.vmem [resolvable:$true] %s1495_s30 }
 0x233   : > { %s2027_s20 = scalar_lea.vmem %s2532_s30, 256  ;;  %p2034_p2 = scmp.lt.s32.totalorder %s2532_s30, %s2032_s19 }
 0x234   : > { %p2028_p6 = scmp.ne.s32.totalorder %s2532_s30, %s2027_s20  ;;  %p2035_p3 = scmp.lt.s32.totalorder %s2033_s26, %s2027_s20 }
 0x236   : > { %p2029_p10 = pnand %p2028_p6, %p2656_p9  ;;  %p2036_p4 = por %p2035_p3, %p2034_p2 }
 0x238   : > { %p2030_p12 = pneg %p2029_p10 }
 0x23a   : > { %p2037_p7 = pnand %p2036_p4, %p2030_p12 }
 0x2a0   : > { %v1121_v25 = vpop.permute.xlu1 %1120 }
 0x2a1   : > { %v1126_v27 = vadd.f32 %v1121_v25, %v1094_v4 }
 0x2a4   : > { %v1123_v26 = vpop.permute.xlu1 %1122 }
 0x2a5   : > { %v1127_v28 = vadd.f32 %v1123_v26, %v1097_v8 }
 0x2a7   : > { %v1128_v30 = vpack.c.bf16 %v1127_v28, %v1126_v27 }
 0x2a9   : > { %1829 = vmatmul.mubr.msk.bf16.vlgmr.msra.gmra.mrb[4].mxu0 %vm1144_vm7, %v1128_v30 }
 0x2aa   : > { %1833 = vmatpush3.bf16.msra.mxu0 %v1975_v29  ;;  %1840 = vmatprep.mubr.msk.bf16.mxu0 %vm2131_vm0, %v2130_v0 }
 0x2ab   : > { %1834 = vmatprep.subr.bf16.mxu0 %v2130_v0 }
 0x2ae   : > { %1835 = vmatpush3.bf16.msra.mxu0 %v1976_v31 }
 0x2af   : > { %1836 = vmatprep.subr.bf16.mxu0 %v2130_v0 }
 0x2b2   : > { %1837 = vmatpush3.bf16.msra.mxu0 %v1977_v32 }
 0x2b3   : > { %1838 = vmatprep.subr.bf16.mxu0 %v2130_v0 }
 0x2b6   : > { %1839 = vmatpush3.bf16.msra.mxu0 %v1978_v33 }
 0x2b9   : > { %1841 = vmatmul.mubr.msk.bf16.vlgmr.msra.gmra.mrb[4].mxu0 %vm967_vm6, %v2431_v40 }
 0x38c   : > { %v1255_v40 = vpop.f32.mrb[4].mxu0 }
 0x38d   : > { %v1860_v41 = vadd.f32 %v1697_v39, %v1255_v40  ;;  %v1842_v42 = vpop.f32.mrb[5].mxu0 }
 0x38e   : > { %v1258_v43 = vpop.f32.mrb[6].mxu0 }
 0x38f   : > { %v1861_v44 = vadd.f32 %v1697_v39, %v1258_v43  ;;  %v1843_v45 = vpop.f32.mrb[7].mxu0  ;;  %v1264_v46 = vmax.f32 %v1860_v41, 0.0 }
 0x391   : > { %v1265_v47 = vmax.f32 %v1861_v44, 0.0 }
 0x393   : > { %v1266_v49 = vpack.c.bf16 %v1265_v47, %v1264_v46 }
 0x395   : > { %1717 = vmatmul.mubr.msk.bf16.vlgmr.msra.gmra.mrb[8].mxu1 %vm967_vm6, %v1266_v49 }
 0x396   : > { %1845 = vmatpush3.bf16.msra.mxu1 %v1991_v48  ;;  %1852 = vmatprep.mubr.msk.bf16.mxu1 %vm2131_vm0, %v2130_v0 }
 0x397   : > { %1846 = vmatprep.subr.bf16.mxu1 %v2130_v0 }
 0x39a   : > { %1847 = vmatpush3.bf16.msra.mxu1 %v1992_v50 }
 0x39b   : > { %1848 = vmatprep.subr.bf16.mxu1 %v2130_v0 }
 0x39e   : > { %1849 = vmatpush3.bf16.msra.mxu1 %v1993_v51 }
 0x39f   : > { %1850 = vmatprep.subr.bf16.mxu1 %v2130_v0 }
 0x3a2   : > { %1851 = vmatpush3.bf16.msra.mxu1 %v1994_v52 }
 0x3a5   : > { %1853 = vmatmul.mubr.msk.bf16.vlgmr.msra.gmra.mrb[12].mxu1 %vm967_vm6, %v1266_v49 }
 0x3a6   : > { %2040 = shalt.err (!%p2037_p7)
}
 0x3a7   : > { %s2041_s27 = scalar_lea.hbm %s2537_s23, 256  ;;  %s2045_s28 = scalar_lea.hbm %s2633_s16, 512 }
 0x3a8   : > { %p2042_p8 = scmp.ne.s32.totalorder %s2537_s23, %s2041_s27  ;;  %p2046_p1 = scmp.lt.u32.totalorder %s2537_s23, %s2633_s16 }
 0x3a9   : > { %p2047_p0 = scmp.lt.u32.totalorder %s2045_s28, %s2041_s27  ;;  %p2049_p6 = scmp.lt.u32.totalorder %s2041_s27, %s2537_s23 }
 0x3aa   : > { %p2043_p11 = pnand %p2042_p8, %p2656_p9 }
 0x3ab   : > { %p2048_p5 = por %p2047_p0, %p2046_p1 }
 0x3ac   : > { %p2044_p13 = pneg %p2043_p11 }
 0x3ad   : > { %p2050_p10 = por %p2049_p6, %p2048_p5 }
 0x3af   : > { %p2051_p12 = pnand %p2050_p10, %p2044_p13 }
 0x3b1   : > { %2054 = shalt.err (!%p2051_p12)
}
 0x3b2   : > { %s2137_s20 = smov 128   ;;  %s2138_s26 = smov 8   ;;  %v1286_v0 = vshrl.u32 %v622_v18, 7  ;;  %v1283_v54 = vld [vmem:[%s2631_s14] sm:$0x7] }
 0x3b3   : > { %s2657_s21 = scalar_lea.sflag [#allocation7], %s2462_s29  ;;  %s1870_s27 = smul.u32 48, %s2462_s29 }
 0x3b4   : > { %1877 = dma.vmem_to_hbm [thread:$0]  (%p2656_p9), %s2532_s30, 256, %s2537_s23, %s2657_s21, %s2137_s20, %s2137_s20, %s2138_s26   ;;  %v1287_v53 = vsub.s32 0, %v1286_v0  ;;  %v1291_v55 = vsub.s32 1, %v1286_v0  ;;  %v1295_v2 = vsub.s32 2, %v1286_v0 }
 0x3b5   : > { %s584_s28 = scalar_lea.vmem [#allocation5], %s1870_s27  ;;  %s1871_s30 = smul.u32 768, %s2248_s25 }
 0x3b6   : > { %v1288_v56 = vrot.slane %v1283_v54, %v1287_v53  ;;  %v1292_v57 = vrot.slane %v1283_v54, %v1291_v55  ;;  %v1296_v3 = vrot.slane %v1283_v54, %v1295_v2  ;;  %s1479_s23 = sshll.u32 %s584_s28, 4  ;;  %s1460_s25 = scalar_lea.sflag [#allocation4], %s2462_s29  ;;  %s2569_s23 = int_to_ptr.vmem [resolvable:$true] %s1479_s23 }
 0x3b7   : > { %s2574_s26 = scalar_lea.hbm %s2632_s15, %s1871_s30  ;;  %s2055_s21 = scalar_lea.vmem %s2569_s23, 768 }
 0x3b8   : > { %p2056_p2 = scmp.ne.s32.totalorder %s2569_s23, %s2055_s21  ;;  %s2139_s18 = smov [#allocation5]  }
 0x3b9   : > { %s2059_s17 = sshll.u32 %s2139_s18, 4  ;;  %s2060_s17 = int_to_ptr.vmem [resolvable:$false] %s2059_s17 }
 0x3ba   : > { %p2057_p3 = pnand %p2056_p2, %p2656_p9  ;;  %s2061_s27 = scalar_lea.vmem %s2060_s17, 1536 }
 0x3bb   : > { %p2062_p7 = scmp.lt.s32.totalorder %s2569_s23, %s2060_s17  ;;  %p2063_p8 = scmp.lt.s32.totalorder %s2061_s27, %s2055_s21 }
 0x3bc   : > { %p2058_p4 = pneg %p2057_p3 }
 0x3bd   : > { %p2064_p11 = por %p2063_p8, %p2062_p7 }
 0x3bf   : > { %p2065_p13 = pnand %p2064_p11, %p2058_p4 }
 0x468   : > { %v1401_v58 = vpop.f32.mrb[8].mxu1 }
 0x469   : > { %v1402_v59 = vadd.f32 %v1401_v58, %v1288_v56  ;;  %v1403_v60 = vpop.f32.mrb[9].mxu1 }
 0x46a   : > { %v1404_v61 = vadd.f32 %v1403_v60, %v1292_v57  ;;  %v1405_v62 = vpop.f32.mrb[10].mxu1 }
 0x46b   : > { %1451 = vst [vmem:[%s584_s28] sm:$0xff] %v1402_v59  ;;  %v1406_v63 = vadd.f32 %v1405_v62, %v1288_v56  ;;  %v1407_v1 = vpop.f32.mrb[11].mxu1 }
 0x46c   : > { %1452 = vst [vmem:[%s584_s28 + $0x8] sm:$0xff] %v1404_v61  ;;  %v1408_v18 = vadd.f32 %v1407_v1, %v1292_v57 }
 0x46d   : > { %1454 = vst [vmem:[%s584_s28 + $0x18] sm:$0xff] %v1406_v63 }
 0x46e   : > { %1455 = vst [vmem:[%s584_s28 + $0x20] sm:$0xff] %v1408_v18 }
 0x478   : > { %v1444_v4 = vpop.f32.mrb[12].mxu1 }
 0x479   : > { %v1445_v5 = vadd.f32 %v1444_v4, %v1296_v3  ;;  %v1854_v6 = vpop.f32.mrb[13].mxu1 }
 0x47a   : > { %v1447_v7 = vpop.f32.mrb[14].mxu1 }
 0x47b   : > { %1453 = vst [vmem:[%s584_s28 + $0x10] sm:$0xff] %v1445_v5  ;;  %v1448_v8 = vadd.f32 %v1447_v7, %v1296_v3  ;;  %v1855_v9 = vpop.f32.mrb[15].mxu1 }
 0x47d   : > { %1456 = vst [vmem:[%s584_s28 + $0x28] sm:$0xff] %v1448_v8 }
 0x47e   : > { %2068 = shalt.err (!%p2065_p13)
}
 0x47f   : > { %s2069_s28 = scalar_lea.hbm %s2574_s26, 768  ;;  %s2073_s20 = scalar_lea.hbm %s2632_s15, 1536 }
 0x480   : > { %p2070_p1 = scmp.ne.s32.totalorder %s2574_s26, %s2069_s28  ;;  %p2074_p6 = scmp.lt.u32.totalorder %s2574_s26, %s2632_s15 }
 0x481   : > { %p2075_p10 = scmp.lt.u32.totalorder %s2073_s20, %s2069_s28  ;;  %p2077_p2 = scmp.lt.u32.totalorder %s2069_s28, %s2574_s26 }
 0x482   : > { %p2071_p0 = pnand %p2070_p1, %p2656_p9 }
 0x483   : > { %p2076_p12 = por %p2075_p10, %p2074_p6 }
 0x484   : > { %p2072_p5 = pneg %p2071_p0 }
 0x485   : > { %p2078_p3 = por %p2077_p2, %p2076_p12 }
 0x487   : > { %p2079_p4 = pnand %p2078_p3, %p2072_p5 }
 0x489   : > { %2082 = shalt.err (!%p2079_p4)
}
 0x48a   : > { %s2140_s21 = smov 384   ;;  %s2141_s27 = smov 24  }
 0x48b   : > { %1876 = dma.vmem_to_hbm [thread:$0]  (%p2656_p9), %s2569_s23, 768, %s2574_s26, %s1460_s25, %s2140_s21, %s2140_s21, %s2141_s27  }
 0x48c PF: > { %s2658_s30 = sld [smem:[#allocation11_spill]]  ;;  %s2659_s19 = sld [smem:[#allocation15_spill]] }
 0x48d   : > { %p1893_p7 = scmp.ge.s32.totalorder %s2125_s24, 2 }
 0x492   : > { %s1510_s20 = sand.u32 1, %s2658_s30   ;;  %p2660_p8 = scmp.ne.s32.totalorder %s2659_s19, 0 }
 0x493   : > { %s1511_s28 = scalar_lea.sflag [#allocation4], %s1510_s20 }
 0x494   : > { %p1885_p11 = pnand %p1893_p7, %p2660_p8 }
 0x496   : > { %2104 = dma.done.wait (!%p1885_p11), %s1511_s28, 768  }
 0x497   : > { %2106 = vsyncadd (!%p1885_p11), %s1511_s28, 4294966528  ;;  %s1520_s18 = scalar_lea.sflag [#allocation7], %s1510_s20 }
 0x498   : > { %2108 = dma.done.wait (!%p1885_p11), %s1520_s18, 256  }
 0x499   : > { %2110 = vsyncadd (!%p1885_p11), %s1520_s18, 4294967040  ;;  %s2661_s24 = sld [smem:[#allocation13_spill]]  ;;  %s2662_s17 = sld [smem:[#allocation12_spill]] }
 0x49a   : > { %s2663_s23 = sld [smem:[#allocation14_spill]]  ;;  %s2664_s21 = smov %s2117_s22 }
 0x49f   : > { %p31_p9 = scmp.ge.s32.totalorder %s2661_s24, 4   ;;  %s2665_s22 = smov %s2662_s17 }
 0x4a1   :  { %33 = sbr.rel (!%p31_p9) target bundleno = 8 (0x8), region = 146 }
 0x4a8   :  { %1525 = vsyncpa [#allocation3], 1 }
 0x4a9   :  { %1527 = vsyncpa [#allocation3 + $0x1], 1 }
 0x4aa   :  { %1528 = vsyncpa [#allocation4], 1 }
 0x4ab   :  { %1530 = vsyncpa [#allocation4 + $0x1], 1 }
 0x4ac   :  { %1531 = vsyncpa [#allocation7], 1 }
 0x4ad   :  { %1533 = vsyncpa [#allocation7 + $0x1], 1 }

</bundles_post_ra>
